<compile_context>
chip_gen: v7x
topology: tpu7x:2x2x1
jax: 0.10.0
libtpu: 0.0.40
codegen_flags: <defaults>
</compile_context>

<pallas_src>
import jax
import jax.numpy as jnp
from jax import lax
from jax.experimental import pallas as pl
from jax.experimental.pallas import tpu as pltpu

_EPS = 1e-5


# ---------------------------------------------------------------------------
# Pallas kernel: fused frozen-BN affine over a (tm, tl) tile.
#   x_ref: (tm, tl) activations (native dtype); s_ref/b_ref: (tm, 1) folded per-row params.
# ---------------------------------------------------------------------------
def _fbn_kernel(x_ref, s_ref, b_ref, o_ref):
    x = x_ref[...].astype(jnp.float32)
    o_ref[...] = (x * s_ref[...] + b_ref[...]).astype(o_ref.dtype)


def _round_up(x, m):
    return ((x + m - 1) // m) * m


def _pick_tiles(M, L, itemsize, tile_budget_bytes=16 * 1024 * 1024):
    """Pick (tm, tl) so the double-buffered x in+out tiles fit `tile_budget_bytes`."""
    sub = 8 * max(1, 4 // itemsize)            # sublane multiple: f32 -> 8, bf16 -> 16
    tl = min(2048, _round_up(L, 128))          # lane tile, always a multiple of 128

    if M <= sub:
        tm = M                                 # full-extent row block (exempt from sublane rule)
    else:
        # x in + out, double-buffered => 4 live (tm, tl) buffers of `itemsize` bytes.
        max_tm = tile_budget_bytes // (4 * tl * itemsize)
        tm = min((max_tm // sub) * sub, 512, _round_up(M, sub))
        tm = max(sub, tm)

    # v7x megacore: ensure >= 2 grid steps so both TensorCores get work (no-op on v5e/v6e).
    if pl.cdiv(M, tm) * pl.cdiv(L, tl) < 2:
        if L > 128:
            tl = max(128, _round_up(pl.cdiv(L, 2), 128))
        elif tm > sub:
            tm = max(sub, ((tm // 2) // sub) * sub)
    return tm, tl


def frozen_batch_norm_2d(x, weight, bias, running_mean, running_var):
    """Pallas TPU implementation of FrozenBatchNorm2d.forward on an NCHW tensor."""
    B, C, H, W = x.shape
    M, L = B * C, H * W

    # Fold the frozen statistics into per-channel scale/bias (tiny C-sized math, f32).
    w32 = weight.astype(jnp.float32)
    b32 = bias.astype(jnp.float32)
    rm32 = running_mean.astype(jnp.float32)
    rv32 = running_var.astype(jnp.float32)
    scale = w32 * lax.rsqrt(rv32 + _EPS)
    fbias = b32 - rm32 * scale

    # Row r of the (M, L) view corresponds to channel r % C -> tile each (C,) param B times.
    scale_rows = jnp.tile(scale, B).reshape(M, 1)
    bias_rows = jnp.tile(fbias, B).reshape(M, 1)

    # Lane-dense layout: spatial axis (H*W) is the last dim; x keeps its native dtype.
    x2 = x.reshape(M, L)

    tm, tl = _pick_tiles(M, L, x.dtype.itemsize)
    grid = (pl.cdiv(M, tm), pl.cdiv(L, tl))    # lane axis last -> param blocks reused across j

    out = pl.pallas_call(
        _fbn_kernel,
        out_shape=jax.ShapeDtypeStruct((M, L), x.dtype),
        grid=grid,
        in_specs=[
            pl.BlockSpec((tm, tl), lambda i, j: (i, j)),   # x tile
            pl.BlockSpec((tm, 1), lambda i, j: (i, 0)),    # folded scale rows
            pl.BlockSpec((tm, 1), lambda i, j: (i, 0)),    # folded bias rows
        ],
        out_specs=pl.BlockSpec((tm, tl), lambda i, j: (i, j)),
        compiler_params=pltpu.CompilerParams(
            dimension_semantics=("parallel", "parallel"),
            vmem_limit_bytes=32 * 1024 * 1024),
    )(x2, scale_rows, bias_rows)

    return out.reshape(B, C, H, W)


if __name__ == "__main__":
    key = jax.random.PRNGKey(0)
    kx, kw, kb, km, kv = jax.random.split(key, 5)

    B, C, H, W = 2, 4, 16, 16
    # Frozen (buffer) statistics / affine params; randomized to exercise the math
    # (the module's defaults are weight=1, bias=0, running_mean=0).
    weight = jax.random.normal(kw, (C,), jnp.float32)
    bias = jax.random.normal(kb, (C,), jnp.float32)
    running_mean = jax.random.normal(km, (C,), jnp.float32)
    running_var = jax.random.uniform(kv, (C,), jnp.float32, minval=0.5, maxval=2.0)

    # Pure-JAX reference (identical formula to the PyTorch forward).
    scale_ref = weight * lax.rsqrt(running_var + _EPS)
    bias_ref = bias - running_mean * scale_ref

    # f32 path — bit-level parity with the reference formula.
    x32 = jax.random.normal(kx, (B, C, H, W), jnp.float32)
    out32 = frozen_batch_norm_2d(x32, weight, bias, running_mean, running_var)
    jax.block_until_ready(out32)
    ref32 = x32 * scale_ref[None, :, None, None] + bias_ref[None, :, None, None]
    assert out32.shape == (B, C, H, W) and out32.dtype == jnp.float32
    assert jnp.allclose(out32, ref32, atol=1e-5, rtol=1e-5)

    # bf16 path — native dtype in/out (no wrapper-side f32 copies), f32 math inside the kernel.
    xbf = x32.astype(jnp.bfloat16)
    outbf = frozen_batch_norm_2d(xbf, weight, bias, running_mean, running_var)
    jax.block_until_ready(outbf)
    refbf = (xbf.astype(jnp.float32) * scale_ref[None, :, None, None]
             + bias_ref[None, :, None, None])
    assert outbf.shape == (B, C, H, W) and outbf.dtype == jnp.bfloat16
    assert jnp.allclose(outbf.astype(jnp.float32), refbf, atol=3e-2, rtol=3e-2)

    print("KERNEL_OK")
</pallas_src>

<mosaic_0001>
module attributes {stable_mosaic.version = 11 : i64} {
  func.func @_fbn_kernel(%arg0: i32, %arg1: i32, %arg2: memref<8x128xf32, #tpu.memory_space<vmem>>, %arg3: memref<8x1xf32, #tpu.memory_space<vmem>>, %arg4: memref<8x1xf32, #tpu.memory_space<vmem>>, %arg5: memref<8x128xf32, #tpu.memory_space<vmem>>) attributes {dimension_semantics = [#tpu.dimension_semantics<parallel>, #tpu.dimension_semantics<parallel>], iteration_bounds = array<i64: 1, 2>, scalar_prefetch = 0 : i64, scratch_operands = 0 : i64, tpu.core_type = #tpu.core_type<tc>, window_params = [{transform_indices = @transform_0, window_bounds = array<i64: 8, 128>}, {transform_indices = @transform_1, window_bounds = array<i64: 8, 1>}, {transform_indices = @transform_2, window_bounds = array<i64: 8, 1>}, {transform_indices = @transform_3, window_bounds = array<i64: 8, 128>}]} {
    %c0 = arith.constant 0 : index
    %c0_0 = arith.constant 0 : index
    %0 = vector.load %arg2[%c0, %c0_0] : memref<8x128xf32, #tpu.memory_space<vmem>>, vector<8x128xf32>
    %c0_1 = arith.constant 0 : index
    %c0_2 = arith.constant 0 : index
    %1 = vector.load %arg3[%c0_1, %c0_2] : memref<8x1xf32, #tpu.memory_space<vmem>>, vector<8x1xf32>
    %2 = vector.broadcast %1 : vector<8x1xf32> to vector<8x128xf32>
    %3 = arith.mulf %0, %2 : vector<8x128xf32>
    %c0_3 = arith.constant 0 : index
    %c0_4 = arith.constant 0 : index
    %4 = vector.load %arg4[%c0_3, %c0_4] : memref<8x1xf32, #tpu.memory_space<vmem>>, vector<8x1xf32>
    %5 = vector.broadcast %4 : vector<8x1xf32> to vector<8x128xf32>
    %6 = arith.addf %3, %5 : vector<8x128xf32>
    %c0_5 = arith.constant 0 : index
    %c0_6 = arith.constant 0 : index
    %7 = vector.load %arg5[%c0_5, %c0_6] : memref<8x128xf32, #tpu.memory_space<vmem>>, vector<8x128xf32>
    tpu.vector_store %arg5[%c0_5, %c0_6], %6 {strides = array<i32>} : memref<8x128xf32, #tpu.memory_space<vmem>>, vector<8x128xf32>,
    return
  }
  func.func @transform_0(%arg0: i32, %arg1: i32) -> (i32, i32) {
    %c0_i32 = arith.constant 0 : i32
    return %arg0, %arg1 : i32, i32
  }
  func.func @transform_1(%arg0: i32, %arg1: i32) -> (i32, i32) {
    %c0_i32 = arith.constant 0 : i32
    %c0_i32_0 = arith.constant 0 : i32
    return %arg0, %c0_i32 : i32, i32
  }
  func.func @transform_2(%arg0: i32, %arg1: i32) -> (i32, i32) {
    %c0_i32 = arith.constant 0 : i32
    %c0_i32_0 = arith.constant 0 : i32
    return %arg0, %c0_i32 : i32, i32
  }
  func.func @transform_3(%arg0: i32, %arg1: i32) -> (i32, i32) {
    %c0_i32 = arith.constant 0 : i32
    return %arg0, %arg1 : i32, i32
  }
}

</mosaic_0001>

<bundles_post_ra>
// kernel: tpu_custom_call.1
= control target key start
LH: loop header
LB: loop body
LE: loop exit
PB: predicated region body
PF: predicated region fallthrough
CT: control target
= control target key end

     0   :  { %8 = vsyncpa [#allocation3], 0  ;;  %s655_s0 = inlined_call_operand.vmem [shape: f32[8,256], index: 0, kind: input, shape index: {}]   ;;  %s656_s1 = inlined_call_operand.vmem [shape: f32[8,1], index: 1, kind: input, shape index: {}]   ;;  %s657_s2 = inlined_call_operand.vmem [shape: f32[8,1], index: 2, kind: input, shape index: {}]   ;;  %s658_s3 = inlined_call_operand.hbm [shape: f32[8,256], index: 3, kind: output, shape index: {}]  }
   0x1   :  { %10 = vsyncpa [#allocation3 + $0x1], 0  ;;  %s537_s12 = smov 0   ;;  %s539_s13 = smov 0  }
   0x2   :  { %s541_s14 = smov 0   ;;  %s543_s15 = smov 0  }
   0x3   :  { %s545_s16 = smov 0   ;;  %s547_s17 = smov 0  }
   0x4 LB: > { %s365_s18 = sadd.s32 4294967295, %s513_s17   ;;  %s366_s19 = sadd.s32 4294967294, %s513_s17   ;;  %s513_s17 = sphi %s547_s17, %s16_s17   ;;  %s509_s16 = sphi %s545_s16, %s665_s16   ;;  %s505_s15 = sphi %s543_s15, %s664_s15   ;;  %s501_s14 = sphi %s541_s14, %s663_s14   ;;  %s497_s13 = sphi %s539_s13, %s662_s13   ;;  %s493_s12 = sphi %s537_s12, %s661_s12  }
   0x5   : > { %s25_s20 = sadd.s32 1, %s509_s16  ;;  %s117_s21 = sadd.s32 1, %s501_s14 }
   0x6   : > { %p26_p0 = scmp.ge.s32.totalorder %s25_s20, 2  ;;  %p127_p1 = scmp.ne.s32.totalorder %s501_s14, %s497_s13 }
   0x7   : > { %p128_p2 = scmp.eq.s32.totalorder %s365_s18, 1  ;;  %p133_p3 = scmp.ne.s32.totalorder %s497_s13, %s493_s12 }
   0x8   : > { %s667_s20 = smov (%p26_p0, %s25_s20), 0  ;;  %p134_p5 = scmp.eq.s32.totalorder %s366_s19, 1 }
   0x9   : > { %p577_p4 = por %p128_p2, %p127_p1  ;;  %s113_s23 = ssub.s32 %s509_s16, %s667_s20 }
   0xa   : > { %p371_p6 = scmp.ge.s32.totalorder %s513_s17, 1  ;;  %p115_p7 = scmp.eq.s32.totalorder %s113_s23, 0 }
   0xb   : > { %p584_p8 = por %p134_p5, %p133_p3  ;;  %p177_p9 = scmp.lt.s32.totalorder %s513_s17, 3 }
   0xc   : > { %s590_s25 = scalar_select %p115_p7, %s501_s14, %s117_s21  }
   0xd   : > { %p178_p10 = pnand %p371_p6, %p177_p9 }
   0xe   : > { %v229_v0 = vld [vmem:[%s656_s1] sm:$0xff] (!%p178_p10)  ;;  %v515_v1 = vmov (!%p178_p10), 0   ;;  %p214_p11 = scmp.lt.s32.totalorder (!%p178_p10), %s505_s15, 1  ;;  %s209_s4 = sand.u32 (!%p178_p10), 1, %s497_s13  }
   0xf   : > { %181 = sbr.rel (%p178_p10) target bundleno = 164 (0xa4), region = 32  ;;  %434 = vset.pattern.permute.xlu0 (!%p178_p10), %v515_v1  ;;  %v236_v2 = vld [vmem:[%s657_s2] sm:$0xff] (!%p178_p10)  ;;  %s372_s6 = sshll.u32 (!%p178_p10), %s209_s4, 3 }
  0x10   : > { %232 = vperm.xlu0 (!%p178_p10), %434, %v229_v0   ;;  %s375_s10 = sshll.u32 (!%p178_p10), %s505_s15, 7  ;;  %s211_s11 = scalar_lea.vmem (!%p178_p10), [#allocation2], %s372_s6 }
  0x11   : > { %s260_s18 = sshll.u32 (!%p178_p10), %s211_s11, 4  ;;  %s608_s23 = scalar_lea.hbm (!%p178_p10), %s658_s3, %s375_s10  ;;  %s610_s18 = int_to_ptr.vmem [resolvable:$true] %s260_s18 }
  0x12   : > { %s245_s26 = scalar_lea.sflag (!%p178_p10), [#allocation3], %s209_s4  ;;  %s435_s27 = scalar_lea.vmem (!%p178_p10), %s610_s18, 128 }
  0x13   : > { %p436_p12 = scmp.ne.s32.totalorder (!%p178_p10), %s610_s18, %s435_s27 }
  0x14   : > { %239 = vperm.xlu0 (!%p178_p10), %434, %v236_v2  }
  0x15   : > { %p437_p13 = pnand (!%p178_p10), %p436_p12, %p577_p4 }
  0x16   : > { %s215_s30 = scalar_select %p214_p11, %s505_s15, 1 }
  0x17   : > { %p438_p0 = pneg %p437_p13  ;;  %s516_s15 = smov [#allocation2]  }
  0x18   : > { %s373_s5 = sshll.u32 %s215_s30, 3  ;;  %s439_s28 = sshll.u32 %s516_s15, 4  ;;  %s440_s28 = int_to_ptr.vmem [resolvable:$false] %s439_s28 }
  0x19   : > { %s219_s9 = scalar_lea.vmem %s655_s0, %s373_s5  ;;  %s441_s29 = scalar_lea.vmem %s440_s28, 256 }
  0x1a   : > { %v228_v4 = vld [vmem:[%s219_s9] sm:$0xff]  ;;  %p442_p1 = scmp.lt.s32.totalorder %s610_s18, %s440_s28  ;;  %p443_p2 = scmp.lt.s32.totalorder %s441_s29, %s435_s27 }
  0x1c   : > { %p444_p3 = por %p443_p2, %p442_p1 }
  0x1e   : > { %p445_p5 = pnand %p444_p3, %p438_p0 }
  0x8f   : > { %v233_v3 = vpop.permute.xlu0 %232 }
  0x90   : > { %v235_v5 = vmul.f32 %v233_v3, %v228_v4 }
  0x93   : > { %v240_v6 = vpop.permute.xlu0 %239 }
  0x94   : > { %v242_v7 = vadd.f32 %v240_v6, %v235_v5 }
  0x96   : > { %243 = vst [vmem:[%s211_s11] sm:$0xff] %v242_v7 }
  0x97   : > { %448 = shalt.err (!%p445_p5)
}
  0x98   : > { %s449_s30 = scalar_lea.hbm %s608_s23, 128  ;;  %s453_s6 = scalar_lea.hbm %s658_s3, 256 }
  0x99   : > { %p450_p6 = scmp.ne.s32.totalorder %s608_s23, %s449_s30  ;;  %p454_p10 = scmp.lt.u32.totalorder %s608_s23, %s658_s3 }
  0x9a   : > { %p455_p11 = scmp.lt.u32.totalorder %s453_s6, %s449_s30  ;;  %p457_p13 = scmp.lt.u32.totalorder %s449_s30, %s608_s23 }
  0x9b   : > { %p451_p7 = pnand %p450_p6, %p577_p4 }
  0x9c   : > { %p456_p12 = por %p455_p11, %p454_p10 }
  0x9d   : > { %p452_p9 = pneg %p451_p7 }
  0x9e   : > { %p458_p0 = por %p457_p13, %p456_p12 }
  0xa0   : > { %p459_p1 = pnand %p458_p0, %p452_p9 }
  0xa2   : > { %462 = shalt.err (!%p459_p1)
}
  0xa3   : > { %378 = dma.vmem_to_hbm [thread:$0]  (%p577_p4), %s610_s18, 128, %s608_s23, %s245_s26  }
  0xa4 PF: > { %p384_p2 = scmp.ge.s32.totalorder %s513_s17, 2  ;;  %s272_s9 = sand.u32 1, %s493_s12  }
  0xa5   : > { %s273_s10 = scalar_lea.sflag [#allocation3], %s272_s9 }
  0xa6   : > { %p381_p3 = pnand %p384_p2, %p584_p8 }
  0xa8   : > { %488 = dma.done.wait (!%p381_p3), %s273_s10, 128  }
  0xa9   : > { %490 = vsyncadd (!%p381_p3), %s273_s10, 4294967168  ;;  %s16_s17 = sadd.s32 1, %s513_s17   ;;  %s661_s12 = smov %s497_s13 }
  0xaa   : > { %p13_p5 = scmp.ge.s32.totalorder %s16_s17, 4   ;;  %s662_s13 = smov %s501_s14 }
  0xab   : > { %s663_s14 = smov %s590_s25  ;;  %s664_s15 = smov %s509_s16 }
  0xac   : > { %s665_s16 = smov %s667_s20  ;;  %15 = sbr.rel (!%p13_p5) target bundleno = 4 (0x4), region = 73 }
  0xb3   :  { %278 = vsyncpa [#allocation3], 1 }
  0xb4   :  { %280 = vsyncpa [#allocation3 + $0x1], 1 }

</bundles_post_ra>
